<compile_context>
chip_gen: v7x
topology: tpu7x:2x2x1
jax: 0.10.0
libtpu: 0.0.40
codegen_flags: <defaults>
</compile_context>

<pallas_src>
import functools

import numpy as np
import jax
import jax.numpy as jnp
from jax.experimental import pallas as pl
from jax.experimental.pallas import tpu as pltpu


def _round_up(v: int, m: int) -> int:
    return ((v + m - 1) // m) * m


# ----------------------------------------------------------------------------
# Host-side (NumPy, float64) construction of the ramp filter, cached per size.
# ----------------------------------------------------------------------------
def _get_fourier_filter_np(size: int) -> np.ndarray:
    """Mirror of AbstractFilter._get_fourier_filter: real filter 2*Re(FFT(f))."""
    n = np.concatenate(
        [np.arange(1, size / 2 + 1, 2, dtype=np.float64),
         np.arange(size / 2 - 1, 0, -2, dtype=np.float64)]
    )
    f = np.zeros(size, dtype=np.float64)
    f[0] = 0.25
    f[1::2] = -1.0 / (np.pi * n) ** 2
    # torch sets fourier_filter[:, 1] = fourier_filter[:, 0]; multiplying the
    # view_as_real spectrum by it == scaling the complex spectrum by 2*Re(FFT(f)).
    return 2.0 * np.real(np.fft.fft(f))  # (P,)


@functools.lru_cache(maxsize=None)
def _build_filter_matrix_np(input_size: int) -> np.ndarray:
    """(H, H) float32 matrix M such that filtered = M @ x along the detector axis.

    Re(IDFT diag(filt) DFT) is circulant with first column Re(ifft(filt));
    zero-padding of the input means only the first H rows/cols matter, so M is
    an indexed crop -- no dense PxP FFTs anywhere.
    """
    P = max(64, int(2 ** np.ceil(np.log2(2.0 * input_size))))
    filt = _get_fourier_filter_np(P)                  # (P,) real, float64
    h = np.real(np.fft.ifft(filt))                    # (P,) first circulant column
    idx = (np.arange(input_size)[:, None] - np.arange(input_size)[None, :]) % P
    return h[idx].astype(np.float32)                  # (H, H)


def _vmem_capacity_bytes() -> int:
    """Per-core VMEM capacity; conservative 64 MiB (v7x) if the query fails."""
    try:
        info = pltpu.get_tpu_info()
        cap = int(getattr(info, "vmem_capacity_bytes", 0) or 0)
        if cap > 0:
            return cap
    except Exception:
        pass
    return 64 * 1024 * 1024


# ----------------------------------------------------------------------------
# Pallas kernel: accumulate directly into the f32 output block (resident across
# the K grid axis).  No scratch accumulator, no zero-init pass.
# ----------------------------------------------------------------------------
def _ramp_filter_kernel(a_ref, x_ref, o_ref):
    # a_ref: (tm, tk) bf16 filter tile
    # x_ref: (tk, tw) f32 sinogram tile (cast to bf16 in-register for the MXU)
    # o_ref: (tm, tw) f32 output tile, VMEM-resident across the k grid axis
    k = pl.program_id(3)
    prod = jnp.dot(a_ref[...], x_ref[...].astype(jnp.bfloat16),
                   preferred_element_type=jnp.float32)

    @pl.when(k == 0)
    def _write():
        o_ref[...] = prod

    @pl.when(k > 0)
    def _accumulate():
        o_ref[...] += prod


def ramp_filter(x: jnp.ndarray) -> jnp.ndarray:
    """Equivalent of AbstractFilter.forward (RampFilter.create_filter).

    x: (B, C, H, W) float32, NCHW like the PyTorch module.  Returns same shape.
    """
    B, C, H, W = x.shape
    A_np = _build_filter_matrix_np(H)                 # (H, H) f32, host-built

    # Tiny problems: Pallas fixed overhead + lane padding dominate -> plain XLA.
    if H < 128 or W < 128:
        A = jnp.asarray(A_np)
        return jnp.einsum("ij,bcjw->bciw", A, x).astype(x.dtype)

    BC = B * C
    xr = x.reshape(BC, H, W)                          # free: no HBM relayout
    Wp = _round_up(W, 128)
    if Wp != W:
        xr = jnp.pad(xr, ((0, 0), (0, 0), (0, Wp - W)))

    cap = _vmem_capacity_bytes()
    budget = int(cap * 0.7)                           # headroom for Mosaic scratch

    # Candidate lane-tile widths: multiples of 128 that divide Wp (largest first,
    # capped at 1024) -> no over-padded columns, lane-dense unmasked stores.
    tw_divs = [t * 128 for t in range(Wp // 128, 0, -1)
               if (Wp // 128) % t == 0 and t * 128 <= 1024]

    # ---- path 1: A fully VMEM-resident (K grid axis = 1, X streamed once) ----
    resident_tw = None
    a_res_bytes = 2 * H * H * 2                       # 2 pipeline bufs x bf16 A
    for tw_c in tw_divs:
        # 2x f32 X buf + 2x f32 out buf + bf16 X-cast temp + f32 dot temp.
        tile_bytes = H * tw_c * (2 * 4 + 2 * 4 + 2 + 4)
        if a_res_bytes + tile_bytes <= budget:
            resident_tw = tw_c
            break

    if resident_tw is not None:
        Hp, tm, tk, tw = H, H, H, resident_tw         # full-extent blocks: no H pad
        Ap = jnp.asarray(A_np, dtype=jnp.bfloat16)
    else:
        # ---- path 2: tiled fallback (very large H) with K-axis accumulation ----
        tm, tk = 512, 1024
        Hp = _round_up(H, 1024)
        tw = tw_divs[-1]
        for tw_c in tw_divs:
            tile_bytes = (2 * tm * tk * 2 + 2 * tk * tw_c * 4 +
                          2 * tm * tw_c * 4 + tk * tw_c * 2 + tm * tw_c * 4)
            if tile_bytes <= budget:
                tw = tw_c
                break
        Ap = jnp.pad(jnp.asarray(A_np),
                     ((0, Hp - H), (0, Hp - H))).astype(jnp.bfloat16)
        xr = jnp.pad(xr, ((0, 0), (0, Hp - H), (0, 0)))

    # v7x megacore: make sure there are >= 2 parallel tiles so both TCs are fed.
    if BC * (Hp // tm) * (Wp // tw) < 2 and Wp >= 256:
        for tw_c in tw_divs:
            if tw_c <= Wp // 2:
                tw = tw_c
                break

    n_i, n_j, n_k = Hp // tm, Wp // tw, Hp // tk
    grid = (BC, n_i, n_j, n_k)

    a_spec = pl.BlockSpec((tm, tk), lambda bc, i, j, k: (i, k))
    x_spec = pl.BlockSpec((None, tk, tw), lambda bc, i, j, k: (bc, k, j))
    o_spec = pl.BlockSpec((None, tm, tw), lambda bc, i, j, k: (bc, i, j))

    # Actual VMEM footprint (+40% / +2 MiB headroom), clamped to the chip capacity.
    buf_bytes = (2 * tm * tk * 2 + 2 * tk * tw * 4 + 2 * tm * tw * 4
                 + tk * tw * 2 + tm * tw * 4)
    vmem_limit = min(cap, max(int(buf_bytes * 1.4) + (2 << 20), 8 << 20))

    flops = 2 * Hp * Hp * Wp * BC
    if n_i == 1 and n_k == 1:
        a_bytes = Hp * Hp * 2                         # fetched once (grid-invariant)
    else:
        a_bytes = BC * n_j * Hp * Hp * 2              # re-streamed per (bc, j)
    bytes_accessed = a_bytes + n_i * BC * Hp * Wp * 4 + BC * Hp * Wp * 4

    out = pl.pallas_call(
        _ramp_filter_kernel,
        out_shape=jax.ShapeDtypeStruct((BC, Hp, Wp), jnp.float32),
        grid_spec=pltpu.PrefetchScalarGridSpec(
            num_scalar_prefetch=0,
            grid=grid,
            in_specs=[a_spec, x_spec],
            out_specs=o_spec,
        ),
        compiler_params=pltpu.CompilerParams(
            dimension_semantics=("parallel", "parallel", "parallel", "arbitrary"),
            vmem_limit_bytes=vmem_limit,
        ),
        cost_estimate=pl.CostEstimate(
            flops=flops, transcendentals=0, bytes_accessed=bytes_accessed),
    )(Ap, xr)

    out = out[:, :H, :W].reshape(B, C, H, W)
    return out.astype(x.dtype)


# ----------------------------------------------------------------------------
# Pure-JAX FFT reference mirroring the torch forward, used for a sanity check.
# ----------------------------------------------------------------------------
def _reference_forward(x: jnp.ndarray) -> jnp.ndarray:
    B, C, H, W = x.shape
    P = max(64, int(2 ** np.ceil(np.log2(2.0 * H))))
    filt = jnp.asarray(_get_fourier_filter_np(P), dtype=jnp.float32)   # (P,)
    xp = jnp.pad(x, ((0, 0), (0, 0), (0, P - H), (0, 0)))
    spec = jnp.fft.fft(xp, axis=2) * filt[None, None, :, None]
    res = jnp.real(jnp.fft.ifft(spec, axis=2))
    return res[:, :, :H, :].astype(x.dtype)


if __name__ == "__main__":
    key = jax.random.PRNGKey(0)

    # Small shape consistent with the module (dispatches to the plain-XLA path).
    x_small = jax.random.normal(key, (2, 4, 16, 16), dtype=jnp.float32)
    out_small = jax.block_until_ready(ramp_filter(x_small))
    ref_small = jax.block_until_ready(_reference_forward(x_small))
    assert out_small.shape == x_small.shape
    assert jnp.allclose(out_small, ref_small, atol=1e-4, rtol=1e-4), \
        "small-shape mismatch vs FFT reference"

    # Shape that exercises the Pallas kernel (resident-A path, lane-dense W=128).
    x = jax.random.normal(key, (2, 4, 128, 128), dtype=jnp.float32)
    out = jax.block_until_ready(ramp_filter(x))
    ref = jax.block_until_ready(_reference_forward(x))
    assert out.shape == x.shape
    # bf16 MXU operands (f32 accumulation) -> looser tolerance than pure f32.
    assert jnp.allclose(out, ref, atol=5e-2, rtol=5e-2), "mismatch vs FFT reference"

    print("KERNEL_OK")
</pallas_src>

<mosaic_0001>
module attributes {stable_mosaic.version = 11 : i64} {
  func.func @_ramp_filter_kernel(%arg0: i32, %arg1: i32, %arg2: i32, %arg3: i32, %arg4: memref<128x128xbf16, #tpu.memory_space<vmem>>, %arg5: memref<1x128x128xf32, #tpu.memory_space<vmem>>, %arg6: memref<1x128x128xf32, #tpu.memory_space<vmem>>) attributes {dimension_semantics = [#tpu.dimension_semantics<parallel>, #tpu.dimension_semantics<parallel>, #tpu.dimension_semantics<parallel>, #tpu.dimension_semantics<arbitrary>], iteration_bounds = array<i64: 8, 1, 1, 1>, scalar_prefetch = 0 : i64, scratch_operands = 0 : i64, tpu.core_type = #tpu.core_type<tc>, window_params = [{transform_indices = @transform_0, window_bounds = array<i64: 128, 128>}, {transform_indices = @transform_1, window_bounds = array<i64: 1, 128, 128>}, {transform_indices = @transform_2, window_bounds = array<i64: 1, 128, 128>}]} {
    %c0 = arith.constant 0 : index
    %c0_0 = arith.constant 0 : index
    %0 = vector.load %arg4[%c0, %c0_0] : memref<128x128xbf16, #tpu.memory_space<vmem>>, vector<128x128xbf16>
    %c0_1 = arith.constant 0 : index
    %c0_2 = arith.constant 0 : index
    %c0_3 = arith.constant 0 : index
    %1 = vector.load %arg5[%c0_1, %c0_2, %c0_3] : memref<1x128x128xf32, #tpu.memory_space<vmem>>, vector<1x128x128xf32>
    %2 = vector.shape_cast %1 : vector<1x128x128xf32> to vector<128x128xf32>
    %3 = arith.truncf %2 : vector<128x128xf32> to vector<128x128xbf16>
    %cst = arith.constant dense<0.000000e+00> : vector<128x128xf32>
    %4 = tpu.matmul %0, %3, %cst {dimension_numbers = #tpu.dot_dimension_numbers<[1], [0], [0], [1], [0, 0, 1, 1], [], []>} : vector<128x128xbf16>, vector<128x128xbf16>, vector<128x128xf32> -> vector<128x128xf32>
    %c0_i32 = arith.constant 0 : i32
    %5 = arith.cmpi eq, %arg3, %c0_i32 : i32
    %6 = arith.extui %5 : i1 to i32
    %c0_i32_4 = arith.constant 0 : i32
    %7 = arith.cmpi ne, %6, %c0_i32_4 : i32
    scf.if %7 {
      %c0_7 = arith.constant 0 : index
      %c0_8 = arith.constant 0 : index
      %c0_9 = arith.constant 0 : index
      %11 = vector.load %arg6[%c0_7, %c0_8, %c0_9] : memref<1x128x128xf32, #tpu.memory_space<vmem>>, vector<1x128x128xf32>
      %12 = vector.shape_cast %11 : vector<1x128x128xf32> to vector<128x128xf32>
      %13 = vector.shape_cast %4 : vector<128x128xf32> to vector<1x128x128xf32>
      tpu.vector_store %arg6[%c0_7, %c0_8, %c0_9], %13 {strides = array<i32>} : memref<1x128x128xf32, #tpu.memory_space<vmem>>, vector<1x128x128xf32>,
    } else {
    }
    %c0_i32_5 = arith.constant 0 : i32
    %8 = arith.cmpi sgt, %arg3, %c0_i32_5 : i32
    %9 = arith.extui %8 : i1 to i32
    %c0_i32_6 = arith.constant 0 : i32
    %10 = arith.cmpi ne, %9, %c0_i32_6 : i32
    scf.if %10 {
      %c0_7 = arith.constant 0 : index
      %c0_8 = arith.constant 0 : index
      %c0_9 = arith.constant 0 : index
      %11 = vector.load %arg6[%c0_7, %c0_8, %c0_9] : memref<1x128x128xf32, #tpu.memory_space<vmem>>, vector<1x128x128xf32>
      %12 = vector.shape_cast %11 : vector<1x128x128xf32> to vector<128x128xf32>
      %13 = arith.addf %12, %4 : vector<128x128xf32>
      %c0_10 = arith.constant 0 : index
      %c0_11 = arith.constant 0 : index
      %c0_12 = arith.constant 0 : index
      %14 = vector.load %arg6[%c0_10, %c0_11, %c0_12] : memref<1x128x128xf32, #tpu.memory_space<vmem>>, vector<1x128x128xf32>
      %15 = vector.shape_cast %14 : vector<1x128x128xf32> to vector<128x128xf32>
      %16 = vector.shape_cast %13 : vector<128x128xf32> to vector<1x128x128xf32>
      tpu.vector_store %arg6[%c0_10, %c0_11, %c0_12], %16 {strides = array<i32>} : memref<1x128x128xf32, #tpu.memory_space<vmem>>, vector<1x128x128xf32>,
    } else {
    }
    return
  }
  func.func @transform_0(%arg0: i32, %arg1: i32, %arg2: i32, %arg3: i32) -> (i32, i32) {
    %c0_i32 = arith.constant 0 : i32
    return %arg1, %arg3 : i32, i32
  }
  func.func @transform_1(%arg0: i32, %arg1: i32, %arg2: i32, %arg3: i32) -> (i32, i32, i32) {
    %c0_i32 = arith.constant 0 : i32
    return %arg0, %arg3, %arg2 : i32, i32, i32
  }
  func.func @transform_2(%arg0: i32, %arg1: i32, %arg2: i32, %arg3: i32) -> (i32, i32, i32) {
    %c0_i32 = arith.constant 0 : i32
    return %arg0, %arg1, %arg2 : i32, i32, i32
  }
}

</mosaic_0001>

<bundles_post_ra>
// kernel: tpu_custom_call.1
= control target key start
LH: loop header
LB: loop body
LE: loop exit
PB: predicated region body
PF: predicated region fallthrough
CT: control target
= control target key end

     0   :  { %7 = vsyncpa [#allocation3], 0  ;;  %s1220_s0 = inlined_call_operand.hbm [shape: bf16[128,128], index: 0, kind: input, shape index: {}]   ;;  %s1221_s1 = inlined_call_operand.hbm [shape: f32[8,128,128], index: 1, kind: input, shape index: {}]   ;;  %s1222_s2 = inlined_call_operand.hbm [shape: f32[8,128,128], index: 2, kind: output, shape index: {}]  }
   0x1   :  { %8 = vsyncpa [#allocation6], 0 }
   0x2   :  { %10 = vsyncpa [#allocation6 + $0x1], 0 }
   0x3   :  { %11 = vsyncpa [#allocation4], 0 }
   0x4   :  { %13 = vsyncpa [#allocation4 + $0x1], 0  ;;  %s962_s9 = smov 0   ;;  %s964_s10 = smov 0  }
   0x5   :  { %s966_s11 = smov 0   ;;  %s968_s12 = smov 0  }
   0x6   :  { %s970_s13 = smov 0   ;;  %s972_s14 = smov 0  }
   0x7 LB: > { %s614_s15 = sadd.s32 4294967295, %s936_s14   ;;  %s615_s16 = sadd.s32 4294967294, %s936_s14   ;;  %s936_s14 = sphi %s972_s14, %s19_s14   ;;  %s932_s13 = sphi %s970_s13, %s1245_s13   ;;  %s928_s12 = sphi %s968_s12, %s1244_s12   ;;  %s924_s11 = sphi %s966_s11, %s1243_s11   ;;  %s920_s10 = sphi %s964_s10, %s1242_s10   ;;  %s916_s9 = sphi %s962_s9, %s1241_s9  }
   0x8   : > { %p97_p0 = scmp.ne.s32.totalorder %s920_s10, %s916_s9  ;;  %p996_p1 = scmp.eq.s32.totalorder %s614_s15, 0 }
   0x9   : > { %p1000_p2 = scmp.eq.s32.totalorder %s614_s15, 7  ;;  %p131_p3 = scmp.eq.s32.totalorder %s615_s16, 7 }
   0xa   : > { %s1227_s17 = scalar_select %p996_p1, 1, 0 }
   0xb   : > { %s1228_s18 = scalar_select %p1000_p2, 1, 0 }
   0xc   : > { %p1006_p4 = por %p996_p1, %p97_p0  ;;  %p616_p5 = scmp.ge.s32.totalorder %s936_s14, 1 }
   0xd   : > { %p1011_p6 = por %p131_p3, %p97_p0  ;;  %p138_p7 = scmp.lt.s32.totalorder %s936_s14, 9 }
   0xe   : > { %s1229_s19 = scalar_select %p1006_p4, 1, 0 }
   0xf   : > { %s1230_s20 = scalar_select %p1011_p6, 1, 0 }
  0x10   : > { %p1016_p8 = pnand %p616_p5, %p138_p7  ;;  %s938_s22 = smov [#allocation2]  }
  0x11   : > { %s154_s23 = sshll.u32 %s938_s22, 4  ;;  %s45_s25 = sadd.s32 1, %s932_s13  ;;  %s155_s23 = int_to_ptr.vmem [resolvable:$true] %s154_s23 }
  0x12   : > { %s1231_s21 = scalar_select %p1016_p8, 1, 0 }
  0x13   : > { %p713_p9 = pneg %p1016_p8  ;;  %s792_s28 = scalar_lea.hbm %s1220_s0, 1024 }
  0x14   : > { %p793_p11 = scmp.ne.s32.totalorder %s1220_s0, %s792_s28  ;;  %p799_p3 = scmp.lt.u32.totalorder %s792_s28, %s1220_s0 }
  0x15   : > { %p1024_p10 = pnand %p713_p9, %p996_p1 }
  0x17   : > { %p794_p12 = pneg %p1024_p10 }
  0x19   : > { %p795_p13 = pnand %p794_p12, %p793_p11 }
  0x1b   : > { %p796_p0 = pneg %p795_p13 }
  0x1d   : > { %p801_p5 = pnand %p799_p3, %p796_p0 }
  0x1f   : > { %804 = shalt.err (!%p801_p5)
}
  0x20   : > { %s805_s5 = scalar_lea.vmem %s155_s23, 1024  ;;  %p813_p4 = scmp.lt.s32.totalorder %s155_s23, %s155_s23 }
  0x21   : > { %p806_p7 = scmp.ne.s32.totalorder %s155_s23, %s805_s5  ;;  %p814_p1 = scmp.lt.s32.totalorder %s805_s5, %s805_s5 }
  0x23   : > { %p808_p9 = pnand %p806_p7, %p794_p12  ;;  %p815_p8 = por %p814_p1, %p813_p4 }
  0x25   : > { %p809_p6 = pneg %p808_p9 }
  0x27   : > { %p816_p2 = pnand %p815_p8, %p809_p6 }
  0x29   : > { %819 = shalt.err (!%p816_p2)
}
  0x2a   : > { %s939_s6 = smov 64   ;;  %s940_s7 = smov 4  }
  0x2b   : > { %716 = dma.hbm_to_vmem [thread:$0]  (!%p1024_p10), %s1220_s0, 1024, %s155_s23, [#allocation3], %s939_s6, %s939_s6, %s940_s7  }
  0x2c   : > { %p47_p1 = scmp.ge.s32.totalorder %s45_s25, 8  ;;  %s84_s16 = sadd.s32 1, %s924_s11 }
  0x2d   : > { %p91_p2 = scmp.ne.s32.totalorder %s924_s11, %s920_s10  ;;  %p92_p4 = scmp.eq.s32.totalorder %s936_s14, 0 }
  0x2e   : > { %s1247_s25 = smov (%p47_p1, %s45_s25), 0  ;;  %p1234_p8 = scmp.ne.s32.totalorder %s1228_s18, 0 }
  0x2f   : > { %p1051_p6 = por %p92_p4, %p91_p2  ;;  %s77_s24 = ssub.s32 %s932_s13, %s1247_s25 }
  0x30   : > { %p1057_p11 = por %p1234_p8, %p91_p2  ;;  %p726_p12 = scmp.lt.s32.totalorder %s936_s14, 8 }
  0x31   : > { %p82_p10 = scmp.eq.s32.totalorder %s77_s24, 0  ;;  %s168_s23 = sand.u32 1, %s924_s11  }
  0x32   : > { %s619_s27 = sshll.u32 %s168_s23, 7  ;;  %s639_s29 = sshll.u32 %s932_s13, 11 }
  0x33   : > { %s1066_s28 = scalar_select %p82_p10, %s924_s11, %s84_s16  }
  0x34   : > { %s1072_s4 = scalar_lea.hbm %s1221_s1, %s639_s29  ;;  %s172_s18 = scalar_lea.vmem [#allocation5], %s619_s27 }
  0x35   : > { %s182_s5 = sshll.u32 %s172_s18, 4  ;;  %p1078_p13 = pnand %p726_p12, %p1051_p6  ;;  %s1074_s5 = int_to_ptr.vmem [resolvable:$true] %s182_s5 }
  0x36   : > { %s1082_s7 = scalar_lea.sflag [#allocation6], %s168_s23  ;;  %s820_s8 = scalar_lea.hbm %s1072_s4, 2048 }
  0x37   : > { %p821_p0 = scmp.ne.s32.totalorder %s1072_s4, %s820_s8  ;;  %p822_p3 = pneg %p1078_p13 }
  0x38   : > { %s825_s22 = scalar_lea.hbm %s1221_s1, 16384  ;;  %p826_p9 = scmp.lt.u32.totalorder %s1072_s4, %s1221_s1 }
  0x39   : > { %p823_p5 = pnand %p822_p3, %p821_p0  ;;  %p827_p1 = scmp.lt.u32.totalorder %s825_s22, %s820_s8 }
  0x3a   : > { %p829_p4 = scmp.lt.u32.totalorder %s820_s8, %s1072_s4 }
  0x3b   : > { %p824_p7 = pneg %p823_p5  ;;  %p828_p2 = por %p827_p1, %p826_p9 }
  0x3d   : > { %p830_p6 = por %p829_p4, %p828_p2 }
  0x3f   : > { %p831_p8 = pnand %p830_p6, %p824_p7 }
  0x41   : > { %834 = shalt.err (!%p831_p8)
}
  0x42   : > { %s835_s23 = scalar_lea.vmem %s1074_s5, 2048  ;;  %s941_s29 = smov [#allocation5]  }
  0x43   : > { %p836_p12 = scmp.ne.s32.totalorder %s1074_s5, %s835_s23  ;;  %s840_s30 = sshll.u32 %s941_s29, 4  ;;  %s841_s30 = int_to_ptr.vmem [resolvable:$false] %s840_s30 }
  0x44   : > { %s842_s3 = scalar_lea.vmem %s841_s30, 4096  ;;  %p843_p5 = scmp.lt.s32.totalorder %s1074_s5, %s841_s30 }
  0x45   : > { %p838_p10 = pnand %p836_p12, %p822_p3  ;;  %p844_p9 = scmp.lt.s32.totalorder %s842_s3, %s835_s23 }
  0x47   : > { %p839_p0 = pneg %p838_p10  ;;  %p845_p1 = por %p844_p9, %p843_p5 }
  0x49   : > { %p846_p2 = pnand %p845_p1, %p839_p0 }
  0x4b   : > { %849 = shalt.err (!%p846_p2)
}
  0x4c   : > { %s942_s18 = smov 128   ;;  %s943_s8 = smov 8  }
  0x4d   : > { %720 = dma.hbm_to_vmem [thread:$0]  (!%p1078_p13), %s1072_s4, 2048, %s1074_s5, %s1082_s7, %s942_s18, %s942_s18, %s943_s8  }
  0x4e   : > { %p1237_p3 = scmp.ne.s32.totalorder %s1231_s21, 0 }
  0x4f   : > { %p1238_p7 = scmp.ne.s32.totalorder (!%p1237_p3), %s1227_s17, 0 }
  0x50   : > { %194 = sbr.rel (%p1237_p3) target bundleno = 365 (0x16d), region = 28 }
  0x57   : > { %903 = dma.done.wait (%p1238_p7), [#allocation3], 1024  }
  0x58   : > { %905 = vsyncadd (%p1238_p7), [#allocation3], 4294966272  ;;  %s1117_s15 = sand.u32 1, %s920_s10   ;;  %p1239_p13 = scmp.ne.s32.totalorder %s1229_s19, 0 }
  0x59   : > { %s624_s16 = sshll.u32 %s1117_s15, 7  ;;  %s201_s22 = scalar_lea.sflag [#allocation6], %s1117_s15 }
  0x5a   : > { %s1123_s4 = scalar_lea.vmem [#allocation5], %s624_s16 }
  0x5b   : > { %907 = dma.done.wait (%p1239_p13), %s201_s22, 2048  }
  0x5c   : > { %909 = vsyncadd (%p1239_p13), %s201_s22, 4294965248  ;;  %v245_v0 = vld [vmem:[%s1123_s4] sm:$0xff]  ;;  %v246_v1 = vld [vmem:[%s1123_s4 + $0x8] sm:$0xff]  ;;  %s1147_s17 = scalar_lea.vmem [#allocation7], %s624_s16  ;;  %s640_s19 = sshll.u32 %s928_s12, 11 }
  0x5d   : > { %v247_v2 = vld [vmem:[%s1123_s4 + $0x10] sm:$0xff]  ;;  %v261_v3 = vpack.c.bf16 %v246_v1, %v245_v0  ;;  %v248_v4 = vld [vmem:[%s1123_s4 + $0x18] sm:$0xff]  ;;  %v249_v6 = vld [vmem:[%s1123_s4 + $0x20] sm:$0xff]  ;;  %s503_s21 = sshll.u32 %s1147_s17, 4  ;;  %s1164_s7 = scalar_lea.hbm %s1222_s2, %s640_s19  ;;  %s1166_s21 = int_to_ptr.vmem [resolvable:$true] %s503_s21 }
  0x5e   : > { %v262_v5 = vpack.c.bf16 %v248_v4, %v247_v2  ;;  %v250_v7 = vld [vmem:[%s1123_s4 + $0x28] sm:$0xff]  ;;  %v251_v8 = vld [vmem:[%s1123_s4 + $0x30] sm:$0xff]  ;;  %v252_v10 = vld [vmem:[%s1123_s4 + $0x38] sm:$0xff]  ;;  %s487_s12 = scalar_lea.sflag [#allocation4], %s1117_s15  ;;  %s850_s24 = scalar_lea.vmem %s1166_s21, 2048 }
  0x5f   : > { %657 = vmatprep.subr.bf16.mxu0 %v261_v3  ;;  %689 = vmatprep.subr.bf16.mxu1 %v261_v3  ;;  %v263_v9 = vpack.c.bf16 %v250_v7, %v249_v6  ;;  %v784_v11 = vld [vmem:[#allocation2] sm:$0xff]   ;;  %v264_v13 = vpack.c.bf16 %v252_v10, %v251_v8  ;;  %v254_v15 = vld [vmem:[%s1123_s4 + $0x48] sm:$0xff]  ;;  %v255_v17 = vld [vmem:[%s1123_s4 + $0x50] sm:$0xff]  ;;  %p851_p4 = scmp.ne.s32.totalorder %s1166_s21, %s850_s24  ;;  %s944_s27 = smov [#allocation7]  }
  0x60   : > { %658 = vmatpush3.bf16.msra.mxu0 %v261_v3  ;;  %697 = vmatpush3.bf16.msra.mxu1 %v261_v3  ;;  %v785_v12 = vld [vmem:[#allocation2 + $0x20] sm:$0xff]   ;;  %v256_v18 = vld [vmem:[%s1123_s4 + $0x58] sm:$0xff]  ;;  %v258_v21 = vld [vmem:[%s1123_s4 + $0x68] sm:$0xff]  ;;  %s854_s23 = sshll.u32 %s944_s27, 4  ;;  %s855_s23 = int_to_ptr.vmem [resolvable:$false] %s854_s23 }
  0x61   : > { %659 = vmatprep.subr.bf16.mxu0 %v262_v5  ;;  %690 = vmatprep.subr.bf16.mxu1 %v262_v5  ;;  %v253_v14 = vld [vmem:[%s1123_s4 + $0x40] sm:$0xff]  ;;  %v266_v19 = vpack.c.bf16 %v256_v18, %v255_v17  ;;  %v259_v23 = vld [vmem:[%s1123_s4 + $0x70] sm:$0xff]  ;;  %v260_v24 = vld [vmem:[%s1123_s4 + $0x78] sm:$0xff]  ;;  %p852_p6 = pnand %p851_p4, %p1057_p11  ;;  %s856_s29 = scalar_lea.vmem %s855_s23, 4096 }
  0x62   : > { %673 = vmatprep.mubr.bf16.mxu0 %v784_v11  ;;  %681 = vmatprep.mubr.bf16.mxu1 %v785_v12  ;;  %v265_v16 = vpack.c.bf16 %v254_v15, %v253_v14  ;;  %v257_v20 = vld [vmem:[%s1123_s4 + $0x60] sm:$0xff]  ;;  %v268_v25 = vpack.c.bf16 %v260_v24, %v259_v23  ;;  %v786_v26 = vld [vmem:[#allocation2 + $0x8] sm:$0xff]   ;;  %v788_v28 = vld [vmem:[#allocation2 + $0x10] sm:$0xff]   ;;  %p857_p12 = scmp.lt.s32.totalorder %s1166_s21, %s855_s23  ;;  %p858_p10 = scmp.lt.s32.totalorder %s856_s29, %s850_s24 }
  0x63   : > { %v267_v22 = vpack.c.bf16 %v258_v21, %v257_v20  ;;  %v787_v27 = vld [vmem:[#allocation2 + $0x28] sm:$0xff]   ;;  %v789_v29 = vld [vmem:[#allocation2 + $0x30] sm:$0xff]   ;;  %v790_v30 = vld [vmem:[#allocation2 + $0x18] sm:$0xff]   ;;  %p853_p8 = pneg %p852_p6 }
  0x64   : > { %660 = vmatpush3.bf16.msra.mxu0 %v262_v5  ;;  %698 = vmatpush3.bf16.msra.mxu1 %v262_v5  ;;  %v791_v31 = vld [vmem:[#allocation2 + $0x38] sm:$0xff]   ;;  %p859_p0 = por %p858_p10, %p857_p12 }
  0x65   : > { %661 = vmatprep.subr.bf16.mxu0 %v263_v9  ;;  %691 = vmatprep.subr.bf16.mxu1 %v263_v9 }
  0x66   : > { %p860_p5 = pnand %p859_p0, %p853_p8 }
  0x68   : > { %662 = vmatpush3.bf16.msra.mxu0 %v263_v9  ;;  %699 = vmatpush3.bf16.msra.mxu1 %v263_v9 }
  0x69   : > { %663 = vmatprep.subr.bf16.mxu0 %v264_v13  ;;  %692 = vmatprep.subr.bf16.mxu1 %v264_v13 }
  0x6c   : > { %664 = vmatpush3.bf16.msra.mxu0 %v264_v13  ;;  %700 = vmatpush3.bf16.msra.mxu1 %v264_v13 }
  0x6d   : > { %665 = vmatprep.subr.bf16.mxu0 %v265_v16  ;;  %693 = vmatprep.subr.bf16.mxu1 %v265_v16 }
  0x70   : > { %666 = vmatpush3.bf16.msra.mxu0 %v265_v16  ;;  %701 = vmatpush3.bf16.msra.mxu1 %v265_v16 }
  0x71   : > { %667 = vmatprep.subr.bf16.mxu0 %v266_v19  ;;  %694 = vmatprep.subr.bf16.mxu1 %v266_v19 }
  0x74   : > { %668 = vmatpush3.bf16.msra.mxu0 %v266_v19  ;;  %702 = vmatpush3.bf16.msra.mxu1 %v266_v19 }
  0x75   : > { %669 = vmatprep.subr.bf16.mxu0 %v267_v22  ;;  %695 = vmatprep.subr.bf16.mxu1 %v267_v22 }
  0x78   : > { %670 = vmatpush3.bf16.msra.mxu0 %v267_v22  ;;  %703 = vmatpush3.bf16.msra.mxu1 %v267_v22 }
  0x79   : > { %671 = vmatprep.subr.bf16.mxu0 %v268_v25  ;;  %696 = vmatprep.subr.bf16.mxu1 %v268_v25 }
  0x7c   : > { %672 = vmatpush3.bf16.msra.mxu0 %v268_v25  ;;  %704 = vmatpush3.bf16.msra.mxu1 %v268_v25 }
  0x7f   : > { %674 = vmatmul.mubr.bf16.vlgmr.msra.gmra.mrb[0].mxu0 %v786_v26  ;;  %682 = vmatmul.mubr.bf16.vlgmr.msra.gmra.mrb[0].mxu1 %v787_v27 }
  0x80   : > { %677 = vmatprep.mubr.bf16.mxu0 %v788_v28  ;;  %685 = vmatprep.mubr.bf16.mxu1 %v789_v29 }
  0x87   : > { %678 = vmatmul.mubr.bf16.gmra.mrb[4].mxu0 %v790_v30  ;;  %686 = vmatmul.mubr.bf16.gmra.mrb[4].mxu1 %v791_v31 }
 0x152   : > { %v675_v32 = vpop.f32.mrb[0].mxu0  ;;  %v683_v33 = vpop.f32.mrb[0].mxu1 }
 0x153   : > { %420 = vst [vmem:[%s1147_s17 + $0x10] sm:$0xff] %v675_v32  ;;  %428 = vst [vmem:[%s1147_s17 + $0x50] sm:$0xff] %v683_v33  ;;  %v351_v34 = vpop.f32.mrb[1].mxu0  ;;  %v383_v35 = vpop.f32.mrb[1].mxu1 }
 0x154   : > { %418 = vst [vmem:[%s1147_s17] sm:$0xff] %v351_v34  ;;  %426 = vst [vmem:[%s1147_s17 + $0x40] sm:$0xff] %v383_v35  ;;  %v676_v36 = vpop.f32.mrb[2].mxu0  ;;  %v684_v37 = vpop.f32.mrb[2].mxu1 }
 0x155   : > { %421 = vst [vmem:[%s1147_s17 + $0x18] sm:$0xff] %v676_v36  ;;  %429 = vst [vmem:[%s1147_s17 + $0x58] sm:$0xff] %v684_v37  ;;  %v354_v38 = vpop.f32.mrb[3].mxu0  ;;  %v386_v39 = vpop.f32.mrb[3].mxu1 }
 0x156   : > { %419 = vst [vmem:[%s1147_s17 + $0x8] sm:$0xff] %v354_v38  ;;  %427 = vst [vmem:[%s1147_s17 + $0x48] sm:$0xff] %v386_v39 }
 0x15a   : > { %v679_v40 = vpop.f32.mrb[4].mxu0  ;;  %v687_v41 = vpop.f32.mrb[4].mxu1 }
 0x15b   : > { %424 = vst [vmem:[%s1147_s17 + $0x30] sm:$0xff] %v679_v40  ;;  %432 = vst [vmem:[%s1147_s17 + $0x70] sm:$0xff] %v687_v41  ;;  %v367_v42 = vpop.f32.mrb[5].mxu0  ;;  %v399_v43 = vpop.f32.mrb[5].mxu1 }
 0x15c   : > { %422 = vst [vmem:[%s1147_s17 + $0x20] sm:$0xff] %v367_v42  ;;  %430 = vst [vmem:[%s1147_s17 + $0x60] sm:$0xff] %v399_v43  ;;  %v680_v44 = vpop.f32.mrb[6].mxu0  ;;  %v688_v45 = vpop.f32.mrb[6].mxu1 }
 0x15d   : > { %425 = vst [vmem:[%s1147_s17 + $0x38] sm:$0xff] %v680_v44  ;;  %433 = vst [vmem:[%s1147_s17 + $0x78] sm:$0xff] %v688_v45  ;;  %v370_v46 = vpop.f32.mrb[7].mxu0  ;;  %v402_v47 = vpop.f32.mrb[7].mxu1 }
 0x15e   : > { %423 = vst [vmem:[%s1147_s17 + $0x28] sm:$0xff] %v370_v46  ;;  %431 = vst [vmem:[%s1147_s17 + $0x68] sm:$0xff] %v402_v47 }
 0x15f   : > { %863 = shalt.err (!%p860_p5)
}
 0x160   : > { %s864_s30 = scalar_lea.hbm %s1164_s7, 2048  ;;  %s868_s8 = scalar_lea.hbm %s1222_s2, 16384 }
 0x161   : > { %p865_p9 = scmp.ne.s32.totalorder %s1164_s7, %s864_s30  ;;  %p869_p3 = scmp.lt.u32.totalorder %s1164_s7, %s1222_s2 }
 0x162   : > { %p870_p7 = scmp.lt.u32.totalorder %s868_s8, %s864_s30  ;;  %p872_p4 = scmp.lt.u32.totalorder %s864_s30, %s1164_s7 }
 0x163   : > { %p866_p1 = pnand %p865_p9, %p1057_p11 }
 0x164   : > { %p871_p13 = por %p870_p7, %p869_p3 }
 0x165   : > { %p867_p2 = pneg %p866_p1 }
 0x166   : > { %p873_p6 = por %p872_p4, %p871_p13 }
 0x168   : > { %p874_p8 = pnand %p873_p6, %p867_p2 }
 0x16a   : > { %877 = shalt.err (!%p874_p8)
}
 0x16b   : > { %s945_s4 = smov 128   ;;  %s946_s17 = smov 8  }
 0x16c   : > { %711 = dma.vmem_to_hbm [thread:$0]  (%p1057_p11), %s1166_s21, 2048, %s1164_s7, %s487_s12, %s945_s4, %s945_s4, %s946_s17  }
 0x16d PF: > { %p728_p12 = scmp.ge.s32.totalorder %s936_s14, 2  ;;  %s518_s19 = sand.u32 1, %s916_s9  }
 0x16e   : > { %p1240_p10 = scmp.ne.s32.totalorder %s1230_s20, 0  ;;  %s519_s5 = scalar_lea.sflag [#allocation4], %s518_s19 }
 0x170   : > { %p722_p0 = pnand %p728_p12, %p1240_p10 }
 0x172   : > { %911 = dma.done.wait (!%p722_p0), %s519_s5, 2048  }
 0x173   : > { %913 = vsyncadd (!%p722_p0), %s519_s5, 4294965248  ;;  %s19_s14 = sadd.s32 1, %s936_s14   ;;  %s1241_s9 = smov %s920_s10 }
 0x174   : > { %p16_p5 = scmp.ge.s32.totalorder %s19_s14, 10   ;;  %s1242_s10 = smov %s924_s11 }
 0x175   : > { %s1243_s11 = smov %s1066_s28  ;;  %s1244_s12 = smov %s932_s13 }
 0x176   : > { %s1245_s13 = smov %s1247_s25  ;;  %18 = sbr.rel (!%p16_p5) target bundleno = 7 (0x7), region = 87 }
 0x17d   :  { %524 = vsyncpa [#allocation3], 1 }
 0x17e   :  { %526 = vsyncpa [#allocation3 + $0x1], 1 }
 0x17f   :  { %527 = vsyncpa [#allocation6], 1 }
 0x180   :  { %529 = vsyncpa [#allocation6 + $0x1], 1 }
 0x181   :  { %530 = vsyncpa [#allocation4], 1 }
 0x182   :  { %532 = vsyncpa [#allocation4 + $0x1], 1 }

</bundles_post_ra>
